<compile_context>
chip_gen: v7x
topology: tpu7x:2x2x1
jax: 0.10.0
libtpu: 0.0.40
codegen_flags: <defaults>
</compile_context>

<pallas_src>
import functools

import jax
import jax.numpy as jnp
from jax.experimental import pallas as pl
from jax.experimental.pallas import tpu as pltpu


def _clamp_vmem(nbytes):
    return int(min(64 * 1024 * 1024, max(16 * 1024 * 1024, nbytes)))


# ---------------------------------------------------------------------------
# Path 1: fused single-step kernel (whole problem resident in VMEM).
# ---------------------------------------------------------------------------
def _gfgcn_fused_kernel(x_ref, s_ref, w_ref, b_ref, o_ref, *, K, mm_dtype):
    """Single grid step; K is static so the tap recursion is fully unrolled.

    x_ref : (N, Fin)        input features (original dtype)
    s_ref : (N, N)          graph shift operator (already in mm_dtype)
    w_ref : (K, Fin, Fout)  filter taps (already in mm_dtype, Fout lane-padded)
    b_ref : (1, Fout)       bias, f32 (lane-padded)
    o_ref : (N, Fout)       output
    """
    sx = x_ref[...].astype(jnp.float32)                 # f32 carry of S^k X
    acc = jnp.dot(sx.astype(mm_dtype), w_ref[0],
                  preferred_element_type=jnp.float32)
    if K > 1:
        s = s_ref[...]                                  # mm_dtype MXU operand
        for k in range(1, K):                           # unrolled (K static)
            sx = jnp.dot(s, sx.astype(mm_dtype),
                         preferred_element_type=jnp.float32)
            acc = acc + jnp.dot(sx.astype(mm_dtype), w_ref[k],
                                preferred_element_type=jnp.float32)
    o_ref[...] = (acc + b_ref[...]).astype(o_ref.dtype)  # f32 epilogue


def _gfgcn_fused(X, S_mm, W_mm, b2, *, K, mm_dtype, out_dtype, vmem_limit_bytes):
    N, Fin = X.shape
    Fout = W_mm.shape[-1]
    kernel = functools.partial(_gfgcn_fused_kernel, K=K, mm_dtype=mm_dtype)
    return pl.pallas_call(
        kernel,
        out_shape=jax.ShapeDtypeStruct((N, Fout), out_dtype),
        grid_spec=pltpu.PrefetchScalarGridSpec(
            num_scalar_prefetch=0,
            grid=(1,),                                            # collapsed grid
            in_specs=[
                pl.BlockSpec((N, Fin), lambda i: (0, 0)),           # X
                pl.BlockSpec((N, N), lambda i: (0, 0)),             # S (mm dtype)
                pl.BlockSpec((K, Fin, Fout), lambda i: (0, 0, 0)),  # W (mm dtype)
                pl.BlockSpec((1, Fout), lambda i: (0, 0)),          # bias
            ],
            out_specs=pl.BlockSpec((N, Fout), lambda i: (0, 0)),
        ),
        compiler_params=pltpu.CompilerParams(
            dimension_semantics=("arbitrary",),
            vmem_limit_bytes=vmem_limit_bytes,
        ),
    )(X, S_mm, W_mm, b2)


# ---------------------------------------------------------------------------
# Path 2a: streamed propagation  Z[k] = S^{k+1} X  (S row-slabs, ping-pong carry)
# ---------------------------------------------------------------------------
def _gfgcn_propagate_kernel(x_ref, s_ref, z_ref, sx_ref, *, row_block, mm_dtype):
    """grid = (K-1, N // row_block), both axes sequential (carry in scratch).

    x_ref : (N, Fin)            full X (constant block, resident)
    s_ref : (row_block, N)      streamed row slab of S (mm_dtype)
    z_ref : (1, row_block, Fin) output block of Z[k] = S^{k+1} X (mm_dtype)
    sx_ref: (2, N, Fin) f32     ping-pong carry (read slot k%2, write 1-k%2)
    """
    k = pl.program_id(0)          # tap index (computes S^{k+1} X)
    i = pl.program_id(1)          # row-tile index
    r = k % 2                     # ping-pong read slot

    @pl.when((k == 0) & (i == 0))
    def _init():
        sx_ref[0, :, :] = x_ref[...].astype(jnp.float32)

    prev = sx_ref[pl.ds(r, 1), :, :][0]                 # (N, Fin) f32 = S^k X
    rows = jnp.dot(s_ref[...], prev.astype(mm_dtype),
                   preferred_element_type=jnp.float32)  # (row_block, Fin) f32
    start = pl.multiple_of(i * row_block, row_block)
    sx_ref[pl.ds(1 - r, 1), pl.ds(start, row_block), :] = rows[None]
    z_ref[0, :, :] = rows.astype(z_ref.dtype)


def _gfgcn_propagate(X, S_mm, *, K, row_block, mm_dtype, vmem_limit_bytes):
    N, Fin = X.shape
    n_row_tiles = N // row_block
    kernel = functools.partial(_gfgcn_propagate_kernel,
                               row_block=row_block, mm_dtype=mm_dtype)
    return pl.pallas_call(
        kernel,
        out_shape=jax.ShapeDtypeStruct((K - 1, N, Fin), mm_dtype),
        grid_spec=pltpu.PrefetchScalarGridSpec(
            num_scalar_prefetch=0,
            grid=(K - 1, n_row_tiles),     # taps outer, row tiles inner
            in_specs=[
                pl.BlockSpec((N, Fin), lambda k, i: (0, 0)),        # X resident
                pl.BlockSpec((row_block, N), lambda k, i: (i, 0)),  # S row slab
            ],
            out_specs=pl.BlockSpec((1, row_block, Fin), lambda k, i: (k, i, 0)),
            scratch_shapes=[pltpu.VMEM((2, N, Fin), jnp.float32)],  # ping-pong carry
        ),
        compiler_params=pltpu.CompilerParams(
            dimension_semantics=("arbitrary", "arbitrary"),  # carry across both axes
            vmem_limit_bytes=vmem_limit_bytes,
        ),
    )(X, S_mm)


# ---------------------------------------------------------------------------
# Path 2b: row-parallel wide contraction  out = Z(N,K*Fin) @ W(K*Fin,Fout) + b
# ---------------------------------------------------------------------------
def _gfgcn_contract_kernel(z_ref, w_ref, b_ref, o_ref):
    acc = jnp.dot(z_ref[...], w_ref[...], preferred_element_type=jnp.float32)
    o_ref[...] = (acc + b_ref[...]).astype(o_ref.dtype)


def _gfgcn_contract(z_wide, w_flat, b2, *, row_block, out_dtype, vmem_limit_bytes):
    N, KFin = z_wide.shape
    Fout = w_flat.shape[-1]
    n_row_tiles = N // row_block
    return pl.pallas_call(
        _gfgcn_contract_kernel,
        out_shape=jax.ShapeDtypeStruct((N, Fout), out_dtype),
        grid_spec=pltpu.PrefetchScalarGridSpec(
            num_scalar_prefetch=0,
            grid=(n_row_tiles,),
            in_specs=[
                pl.BlockSpec((row_block, KFin), lambda i: (i, 0)),  # Z row tile
                pl.BlockSpec((KFin, Fout), lambda i: (0, 0)),       # fused weights
                pl.BlockSpec((1, Fout), lambda i: (0, 0)),          # bias
            ],
            out_specs=pl.BlockSpec((row_block, Fout), lambda i: (i, 0)),
        ),
        compiler_params=pltpu.CompilerParams(
            dimension_semantics=("parallel",),   # megacore / both TCs
            vmem_limit_bytes=vmem_limit_bytes,
        ),
    )(z_wide, w_flat, b2)


# ---------------------------------------------------------------------------
# Public wrapper
# ---------------------------------------------------------------------------
def gfgcn_layer(X, S, W, b=None, *, matmul_dtype=jnp.bfloat16, row_block=None,
                force_tiled=False, pad_out_lanes=True, vmem_limit_bytes=None):
    """X: (N, Fin), S: (N, N), W: (K, Fin, Fout), b: (Fout,) or None -> (N, Fout)."""
    N, Fin = X.shape
    K, Fin_w, Fout = W.shape
    assert Fin_w == Fin and S.shape == (N, N)
    out_dtype = X.dtype
    mm = jnp.dtype(matmul_dtype)
    mm_sz = mm.itemsize
    x_sz = jnp.dtype(X.dtype).itemsize
    o_sz = jnp.dtype(out_dtype).itemsize

    # ---- lane-dense output: pad Fout to a multiple of 128 (unmasked stores) ----
    LANE = 128
    if pad_out_lanes and Fout % LANE != 0:
        Fout_p = ((Fout + LANE - 1) // LANE) * LANE
    else:
        Fout_p = Fout
    pad = Fout_p - Fout
    Wp = jnp.pad(W, ((0, 0), (0, 0), (0, pad))) if pad else W
    bvec = jnp.zeros((Fout,), jnp.float32) if b is None else b.astype(jnp.float32)
    b2 = bvec.reshape(1, Fout)
    if pad:
        b2 = jnp.pad(b2, ((0, 0), (0, pad)))

    def _finish(out):
        return out[:, :Fout] if pad else out

    def _pick_row_block(rb):
        if rb is not None and N % rb == 0 and rb % 8 == 0:
            return rb
        return next((r for r in (1024, 512, 256, 128, 64, 32, 16, 8)
                     if N % r == 0), None)

    # ---- K == 1: S is never used -> one row-tiled matmul --------------------
    if K == 1:
        rb = _pick_row_block(row_block) or N
        w_flat = Wp.reshape(Fin, Fout_p).astype(mm)
        vlim = vmem_limit_bytes or _clamp_vmem(
            2 * (rb * Fin + rb * Fout_p) * max(mm_sz, 4)
            + Fin * Fout_p * mm_sz + (1 << 20))
        return _finish(_gfgcn_contract(X.astype(mm), w_flat, b2, row_block=rb,
                                       out_dtype=out_dtype,
                                       vmem_limit_bytes=vlim))

    # Cast MXU operands once in the wrapper (halves S traffic / VMEM for bf16).
    S_mm = S.astype(mm)

    # ---- dispatch: keep S resident only when it comfortably fits VMEM -------
    fused_working_set = (
        2 * N * N * mm_sz                   # S block (double-buffered)
        + 2 * N * Fin * x_sz                # X
        + 2 * K * Fin * Fout_p * mm_sz      # W
        + 2 * N * Fout_p * o_sz             # output
        + N * Fin * 4 + N * Fout_p * 4      # f32 carry + accumulator values
    )
    VMEM_BUDGET = 40 * 1024 * 1024          # conservative: fits v7x's 64 MiB VMEM

    use_streamed = force_tiled or fused_working_set > VMEM_BUDGET
    rb = _pick_row_block(row_block) if use_streamed else None
    if use_streamed and rb is None:
        # TODO(synk): pad N to a multiple of 8 to enable the streamed path for
        # ragged N; fall back to the fused (resident) path for now.
        use_streamed = False

    if not use_streamed:
        W_mm = Wp.astype(mm)
        vlim = vmem_limit_bytes or _clamp_vmem(int(1.25 * fused_working_set))
        return _finish(_gfgcn_fused(X, S_mm, W_mm, b2, K=K, mm_dtype=mm,
                                    out_dtype=out_dtype, vmem_limit_bytes=vlim))

    # ---- streamed path (large N) --------------------------------------------
    streamed_ws = (2 * rb * N * mm_sz       # S slab (double-buffered)
                   + 2 * N * Fin * 4        # ping-pong f32 carry
                   + 2 * N * Fin * x_sz     # X
                   + 4 * rb * Fin * 4)      # small blocks / slack
    vlim_p = vmem_limit_bytes or _clamp_vmem(int(1.25 * streamed_ws))
    z_tail = _gfgcn_propagate(X, S_mm, K=K, row_block=rb, mm_dtype=mm,
                              vmem_limit_bytes=vlim_p)     # (K-1, N, Fin) mm dtype
    z_all = jnp.concatenate(
        [X.astype(mm)[:, None, :], jnp.transpose(z_tail, (1, 0, 2))],
        axis=1)                                            # (N, K, Fin)
    z_wide = z_all.reshape(N, K * Fin)                     # deep contraction input
    w_flat = Wp.reshape(K * Fin, Fout_p).astype(mm)        # (K*Fin, Fout_p)
    contract_ws = (2 * (rb * K * Fin + rb * Fout_p) * mm_sz
                   + K * Fin * Fout_p * mm_sz + rb * Fout_p * 4)
    vlim_c = vmem_limit_bytes or _clamp_vmem(int(1.5 * contract_ws))
    return _finish(_gfgcn_contract(z_wide, w_flat, b2, row_block=rb,
                                   out_dtype=out_dtype,
                                   vmem_limit_bytes=vlim_c))


def gfgcn_ref(X, S, W, b=None):
    """Pure-JAX reference mirroring the PyTorch forward."""
    K = W.shape[0]
    out = X @ W[0]
    Sx = X
    for k in range(1, K):
        Sx = S @ Sx
        out = out + Sx @ W[k]
    if b is not None:
        out = out + b[None, :]
    return out


if __name__ == "__main__":
    # Small deterministic example consistent with the module's forward:
    # X: (N, in_dim), S: (N, N), W: (K, in_dim, out_dim), b: (out_dim,)
    N, in_dim, out_dim, K = 32, 16, 32, 3

    key = jax.random.PRNGKey(0)
    kx, ks, kw = jax.random.split(key, 3)

    X = jax.random.normal(kx, (N, in_dim), dtype=jnp.float32)
    S_raw = jax.random.uniform(ks, (N, N), dtype=jnp.float32)
    S = S_raw / jnp.sum(S_raw, axis=1, keepdims=True)

    fan_in = in_dim * out_dim
    bound = (6.0 / fan_in) ** 0.5
    W = jax.random.uniform(kw, (K, in_dim, out_dim), dtype=jnp.float32,
                           minval=-bound, maxval=bound)
    b = jnp.zeros((out_dim,), dtype=jnp.float32)

    ref = gfgcn_ref(X, S, W, b)

    # 1) Default path: fused kernel, bf16 MXU operands, f32 accum, lane-padded out.
    out_bf16 = jax.block_until_ready(gfgcn_layer(X, S, W, b))
    assert out_bf16.shape == (N, out_dim)
    err = jnp.max(jnp.abs(out_bf16 - ref))
    assert jnp.allclose(out_bf16, ref, atol=5e-2, rtol=5e-2), f"bf16 max abs err = {err}"

    # 2) Exact f32-matmul variant of the fused kernel.
    out_f32 = jax.block_until_ready(gfgcn_layer(X, S, W, b, matmul_dtype=jnp.float32))
    err = jnp.max(jnp.abs(out_f32 - ref))
    assert jnp.allclose(out_f32, ref, atol=1e-4, rtol=1e-4), f"f32 max abs err = {err}"

    # 3) Streamed / row-tiled path (S slabs + ping-pong carry + wide matmul),
    #    exercised at a small row block to validate the large-N code path.
    out_tiled = jax.block_until_ready(
        gfgcn_layer(X, S, W, b, matmul_dtype=jnp.float32,
                    force_tiled=True, row_block=16))
    err = jnp.max(jnp.abs(out_tiled - ref))
    assert jnp.allclose(out_tiled, ref, atol=1e-4, rtol=1e-4), f"tiled max abs err = {err}"

    # 4) K == 1 path (S never touched).
    W1 = W[:1]
    ref1 = gfgcn_ref(X, S, W1, b)
    out1 = jax.block_until_ready(gfgcn_layer(X, S, W1, b, matmul_dtype=jnp.float32))
    err = jnp.max(jnp.abs(out1 - ref1))
    assert jnp.allclose(out1, ref1, atol=1e-4, rtol=1e-4), f"K=1 max abs err = {err}"

    print("KERNEL_OK")
</pallas_src>

<mosaic_0001>
module attributes {stable_mosaic.version = 11 : i64} {
  func.func @_gfgcn_fused_kernel(%arg0: i32, %arg1: memref<32x16xf32, #tpu.memory_space<vmem>>, %arg2: memref<32x32xbf16, #tpu.memory_space<vmem>>, %arg3: memref<3x16x128xbf16, #tpu.memory_space<vmem>>, %arg4: memref<1x128xf32, #tpu.memory_space<vmem>>, %arg5: memref<32x128xf32, #tpu.memory_space<vmem>>) attributes {dimension_semantics = [#tpu.dimension_semantics<arbitrary>], iteration_bounds = array<i64: 1>, scalar_prefetch = 0 : i64, scratch_operands = 0 : i64, tpu.core_type = #tpu.core_type<tc>, window_params = [{pipeline_mode = #tpu.pipeline_mode<synchronous>, transform_indices = @transform_0, window_bounds = array<i64: 32, 16>}, {pipeline_mode = #tpu.pipeline_mode<synchronous>, transform_indices = @transform_1, window_bounds = array<i64: 32, 32>}, {pipeline_mode = #tpu.pipeline_mode<synchronous>, transform_indices = @transform_2, window_bounds = array<i64: 3, 16, 128>}, {pipeline_mode = #tpu.pipeline_mode<synchronous>, transform_indices = @transform_3, window_bounds = array<i64: 1, 128>}, {pipeline_mode = #tpu.pipeline_mode<synchronous>, transform_indices = @transform_4, window_bounds = array<i64: 32, 128>}]} {
    %c0 = arith.constant 0 : index
    %c0_0 = arith.constant 0 : index
    %0 = vector.load %arg1[%c0, %c0_0] : memref<32x16xf32, #tpu.memory_space<vmem>>, vector<32x16xf32>
    %1 = arith.truncf %0 : vector<32x16xf32> to vector<32x16xbf16>
    %c0_1 = arith.constant 0 : index
    %c0_2 = arith.constant 0 : index
    %c0_3 = arith.constant 0 : index
    %2 = vector.load %arg3[%c0_1, %c0_2, %c0_3] : memref<3x16x128xbf16, #tpu.memory_space<vmem>>, vector<1x16x128xbf16>
    %3 = vector.shape_cast %2 : vector<1x16x128xbf16> to vector<16x128xbf16>
    %cst = arith.constant dense<0.000000e+00> : vector<32x128xf32>
    %4 = tpu.matmul %1, %3, %cst {dimension_numbers = #tpu.dot_dimension_numbers<[1], [0], [0], [1], [0, 0, 1, 1], [], []>} : vector<32x16xbf16>, vector<16x128xbf16>, vector<32x128xf32> -> vector<32x128xf32>
    %c0_4 = arith.constant 0 : index
    %c0_5 = arith.constant 0 : index
    %5 = vector.load %arg2[%c0_4, %c0_5] : memref<32x32xbf16, #tpu.memory_space<vmem>>, vector<32x32xbf16>
    %6 = arith.truncf %0 : vector<32x16xf32> to vector<32x16xbf16>
    %cst_6 = arith.constant dense<0.000000e+00> : vector<32x16xf32>
    %7 = tpu.matmul %5, %6, %cst_6 {dimension_numbers = #tpu.dot_dimension_numbers<[1], [0], [0], [1], [0, 0, 1, 1], [], []>} : vector<32x32xbf16>, vector<32x16xbf16>, vector<32x16xf32> -> vector<32x16xf32>
    %8 = arith.truncf %7 : vector<32x16xf32> to vector<32x16xbf16>
    %c1 = arith.constant 1 : index
    %c0_7 = arith.constant 0 : index
    %c0_8 = arith.constant 0 : index
    %9 = vector.load %arg3[%c1, %c0_7, %c0_8] : memref<3x16x128xbf16, #tpu.memory_space<vmem>>, vector<1x16x128xbf16>
    %10 = vector.shape_cast %9 : vector<1x16x128xbf16> to vector<16x128xbf16>
    %cst_9 = arith.constant dense<0.000000e+00> : vector<32x128xf32>
    %11 = tpu.matmul %8, %10, %cst_9 {dimension_numbers = #tpu.dot_dimension_numbers<[1], [0], [0], [1], [0, 0, 1, 1], [], []>} : vector<32x16xbf16>, vector<16x128xbf16>, vector<32x128xf32> -> vector<32x128xf32>
    %12 = arith.addf %4, %11 : vector<32x128xf32>
    %13 = arith.truncf %7 : vector<32x16xf32> to vector<32x16xbf16>
    %cst_10 = arith.constant dense<0.000000e+00> : vector<32x16xf32>
    %14 = tpu.matmul %5, %13, %cst_10 {dimension_numbers = #tpu.dot_dimension_numbers<[1], [0], [0], [1], [0, 0, 1, 1], [], []>} : vector<32x32xbf16>, vector<32x16xbf16>, vector<32x16xf32> -> vector<32x16xf32>
    %15 = arith.truncf %14 : vector<32x16xf32> to vector<32x16xbf16>
    %c2 = arith.constant 2 : index
    %c0_11 = arith.constant 0 : index
    %c0_12 = arith.constant 0 : index
    %16 = vector.load %arg3[%c2, %c0_11, %c0_12] : memref<3x16x128xbf16, #tpu.memory_space<vmem>>, vector<1x16x128xbf16>
    %17 = vector.shape_cast %16 : vector<1x16x128xbf16> to vector<16x128xbf16>
    %cst_13 = arith.constant dense<0.000000e+00> : vector<32x128xf32>
    %18 = tpu.matmul %15, %17, %cst_13 {dimension_numbers = #tpu.dot_dimension_numbers<[1], [0], [0], [1], [0, 0, 1, 1], [], []>} : vector<32x16xbf16>, vector<16x128xbf16>, vector<32x128xf32> -> vector<32x128xf32>
    %19 = arith.addf %12, %18 : vector<32x128xf32>
    %c0_14 = arith.constant 0 : index
    %c0_15 = arith.constant 0 : index
    %20 = vector.load %arg4[%c0_14, %c0_15] : memref<1x128xf32, #tpu.memory_space<vmem>>, vector<1x128xf32>
    %21 = vector.broadcast %20 : vector<1x128xf32> to vector<32x128xf32>
    %22 = arith.addf %19, %21 : vector<32x128xf32>
    %c0_16 = arith.constant 0 : index
    %c0_17 = arith.constant 0 : index
    %23 = vector.load %arg5[%c0_16, %c0_17] : memref<32x128xf32, #tpu.memory_space<vmem>>, vector<32x128xf32>
    tpu.vector_store %arg5[%c0_16, %c0_17], %22 {strides = array<i32>} : memref<32x128xf32, #tpu.memory_space<vmem>>, vector<32x128xf32>,
    return
  }
  func.func @transform_0(%arg0: i32) -> (i32, i32) {
    %c0_i32 = arith.constant 0 : i32
    %c0_i32_0 = arith.constant 0 : i32
    %c0_i32_1 = arith.constant 0 : i32
    return %c0_i32, %c0_i32_0 : i32, i32
  }
  func.func @transform_1(%arg0: i32) -> (i32, i32) {
    %c0_i32 = arith.constant 0 : i32
    %c0_i32_0 = arith.constant 0 : i32
    %c0_i32_1 = arith.constant 0 : i32
    return %c0_i32, %c0_i32_0 : i32, i32
  }
  func.func @transform_2(%arg0: i32) -> (i32, i32, i32) {
    %c0_i32 = arith.constant 0 : i32
    %c0_i32_0 = arith.constant 0 : i32
    %c0_i32_1 = arith.constant 0 : i32
    %c0_i32_2 = arith.constant 0 : i32
    return %c0_i32, %c0_i32_0, %c0_i32_1 : i32, i32, i32
  }
  func.func @transform_3(%arg0: i32) -> (i32, i32) {
    %c0_i32 = arith.constant 0 : i32
    %c0_i32_0 = arith.constant 0 : i32
    %c0_i32_1 = arith.constant 0 : i32
    return %c0_i32, %c0_i32_0 : i32, i32
  }
  func.func @transform_4(%arg0: i32) -> (i32, i32) {
    %c0_i32 = arith.constant 0 : i32
    %c0_i32_0 = arith.constant 0 : i32
    %c0_i32_1 = arith.constant 0 : i32
    return %c0_i32, %c0_i32_0 : i32, i32
  }
}

</mosaic_0001>

<bundles_post_ra>
// kernel: tpu_custom_call.1
= control target key start
LH: loop header
LB: loop body
LE: loop exit
PB: predicated region body
PF: predicated region fallthrough
CT: control target
= control target key end

     0   :  { %vm41_vm0 = vcmask 261120   ;;  %s566_s0 = inlined_call_operand.vmem [shape: f32[32,16], index: 0, kind: input, shape index: {}]   ;;  %s567_s1 = inlined_call_operand.vmem [shape: bf16[32,32], index: 1, kind: input, shape index: {}]   ;;  %s568_s2 = inlined_call_operand.vmem [shape: bf16[3,16,128], index: 2, kind: input, shape index: {}]   ;;  %s569_s3 = inlined_call_operand.vmem [shape: f32[1,128], index: 3, kind: input, shape index: {}]   ;;  %s570_s4 = inlined_call_operand.hbm [shape: f32[32,128], index: 4, kind: output, shape index: {}]  }
   0x1   :  { %v19_v0 = vld [vmem:[%s566_s0] sm:$0xff]  ;;  %v20_v1 = vld [vmem:[%s566_s0 + $0x8] sm:$0xff]  ;;  %v21_v2 = vld [vmem:[%s566_s0 + $0x10] sm:$0xff] }
   0x2   :  { %v23_v3 = vpack.c.bf16 %v20_v1, %v19_v0  ;;  %v22_v4 = vld [vmem:[%s566_s0 + $0x18] sm:$0xff]  ;;  %v457_v6 = vld [vmem:[%s567_s1] sm:$0xff]  }
   0x3   :  { %v24_v5 = vpack.c.bf16 %v22_v4, %v21_v2  ;;  %416 = vmatprep.mubr.msk.bf16.mxu0 %vm41_vm0, %v457_v6 }
   0x4   :  { %412 = vmatprep.subr.bf16.mxu0 %v23_v3 }
   0x5   :  { %413 = vmatpush3.bf16.msra.mxu0 %v23_v3 }
   0x6   :  { %414 = vmatprep.subr.bf16.mxu0 %v24_v5 }
   0x7   :  { %9 = vsyncpa [#allocation3], 0  ;;  %v458_v7 = vld [vmem:[%s567_s1 + $0x8] sm:$0xff]   ;;  %v460_v9 = vld [vmem:[%s568_s2] sm:$0xff]   ;;  %vm108_vm1 = vcmask 130048   ;;  %s486_s6 = smov [#allocation2]  }
   0x8   :  { %v459_v8 = vld [vmem:[%s568_s2 + $0x8] sm:$0xff]   ;;  %v461_v16 = vld [vmem:[%s568_s2 + $0x10] sm:$0xff]   ;;  %v394_v23 = vld [vmem:[%s569_s3] ss:$0 sm:$0xff]  ;;  %s364_s7 = sshll.u32 %s486_s6, 4  ;;  %s365_s7 = int_to_ptr.vmem [resolvable:$true] %s364_s7 }
   0x9   :  { %415 = vmatpush3.bf16.msra.mxu0 %v24_v5  ;;  %420 = vmatprep.subr.bf16.mxu1 %v459_v8  ;;  %s462_s8 = scalar_lea.vmem %s365_s7, 512  ;;  %p467_p1 = scmp.lt.s32.totalorder %s365_s7, %s365_s7 }
   0xa   :  { %421 = vmatpush3.bf16.msra.mxu1 %v459_v8  ;;  %p463_p0 = scmp.ne.s32.totalorder %s365_s7, %s462_s8  ;;  %p468_p2 = scmp.lt.s32.totalorder %s462_s8, %s462_s8 }
   0xb   :  { %426 = vmatprep.subr.bf16.mxu1 %v460_v9 }
   0xc   :  { %417 = vmatmul.mubr.msk.bf16.vlgmr.msra.gmra.mrb[0].mxu0 %vm41_vm0, %v458_v7  ;;  %p469_p3 = por %p468_p2, %p467_p1 }
   0xd   :  { %436 = vmatprep.mubr.msk.bf16.mxu0 %vm41_vm0, %v457_v6 }
   0xe   :  { %p470_p4 = pnand %p469_p3, %p463_p0 }
  0xdf   :  { %v418_v10 = vpop.f32.mrb[0].mxu0 }
  0xe0   :  { %v82_v11 = vpop.f32.mrb[1].mxu0 }
  0xe1   :  { %v419_v12 = vpop.f32.mrb[2].mxu0 }
  0xe2   :  { %v98_v13 = vpack.c.bf16 %v419_v12, %v418_v10  ;;  %v85_v14 = vpop.f32.mrb[3].mxu0 }
  0xe3   :  { %v97_v15 = vpack.c.bf16 %v85_v14, %v82_v11 }
  0xe5   :  { %422 = vmatprep.mubr.msk.bf16.mxu1 %vm108_vm1, %v97_v15  ;;  %432 = vmatprep.subr.bf16.mxu0 %v97_v15 }
  0xe6   :  { %423 = vmatmul.mubr.msk.bf16.vlgmr.msra.gmra.mrb[0].mxu1 %vm108_vm1, %v98_v13  ;;  %433 = vmatpush3.bf16.msra.mxu0 %v97_v15 }
  0xe7   :  { %434 = vmatprep.subr.bf16.mxu0 %v98_v13  ;;  %427 = vmatpush3.bf16.msra.mxu1 %v460_v9 }
  0xe8   :  { %428 = vmatprep.mubr.msk.bf16.mxu1 %vm108_vm1, %v23_v3  ;;  %440 = vmatprep.subr.bf16.mxu1 %v461_v16 }
  0xea   :  { %435 = vmatpush3.bf16.msra.mxu0 %v98_v13 }
  0xed   :  { %437 = vmatmul.mubr.msk.bf16.vlgmr.msra.gmra.mrb[4].mxu0 %vm41_vm0, %v458_v7 }
  0xf2   :  { %429 = vmatmul.mubr.msk.bf16.vlgmr.msra.gmra.mrb[0].mxu1 %vm108_vm1, %v24_v5 }
  0xf3   :  { %441 = vmatpush3.bf16.msra.mxu1 %v461_v16 }
 0x1c0   :  { %v438_v17 = vpop.f32.mrb[4].mxu0 }
 0x1c1   :  { %v259_v18 = vpop.f32.mrb[5].mxu0 }
 0x1c2   :  { %v439_v19 = vpop.f32.mrb[6].mxu0 }
 0x1c3   :  { %v275_v20 = vpack.c.bf16 %v439_v19, %v438_v17  ;;  %v262_v21 = vpop.f32.mrb[7].mxu0 }
 0x1c4   :  { %v274_v22 = vpack.c.bf16 %v262_v21, %v259_v18 }
 0x1c6   :  { %442 = vmatprep.mubr.msk.bf16.mxu1 %vm108_vm1, %v274_v22 }
 0x1c7   :  { %443 = vmatmul.mubr.msk.bf16.vlgmr.msra.gmra.mrb[0].mxu1 %vm108_vm1, %v275_v20 }
 0x29a   :  { %v444_v24 = vpop.f32.mrb[0].mxu1 }
 0x29b   :  { %v353_v25 = vadd.f32 %v444_v24, %v394_v23  ;;  %v325_v26 = vpop.f32.mrb[1].mxu1 }
 0x29c   :  { %v351_v27 = vadd.f32 %v394_v23, %v325_v26  ;;  %v445_v28 = vpop.f32.mrb[2].mxu1 }
 0x29d   :  { %357 = vst [vmem:[#allocation2 + $0x10] sm:$0xff] %v353_v25  ;;  %v354_v29 = vadd.f32 %v445_v28, %v394_v23  ;;  %v328_v30 = vpop.f32.mrb[3].mxu1 }
 0x29e   :  { %355 = vst [vmem:[#allocation2] sm:$0xff] %v351_v27  ;;  %v352_v31 = vadd.f32 %v394_v23, %v328_v30 }
 0x29f   :  { %358 = vst [vmem:[#allocation2 + $0x18] sm:$0xff] %v354_v29 }
 0x2a0   :  { %356 = vst [vmem:[#allocation2 + $0x8] sm:$0xff] %v352_v31 }
 0x2a1   :  { %473 = shalt.err (!%p470_p4)
}
 0x2a2   :  { %s474_s10 = scalar_lea.hbm %s570_s4, 512 }
 0x2a3   :  { %p475_p5 = scmp.ne.s32.totalorder %s570_s4, %s474_s10  ;;  %p478_p6 = scmp.lt.u32.totalorder %s474_s10, %s570_s4 }
 0x2a5   :  { %p480_p7 = pnand %p478_p6, %p475_p5 }
 0x2a7   :  { %483 = shalt.err (!%p480_p7)
}
 0x2a8   :  { %s487_s15 = smov 128   ;;  %s488_s16 = smov 8  }
 0x2a9   :  { %370 = dma.vmem_to_hbm [thread:$0]  %s365_s7, 512, %s570_s4, [#allocation3], %s487_s15, %s487_s15, %s488_s16  }
 0x2aa   :  { %484 = dma.done.wait [#allocation3], 512  }
 0x2ab   :  { %485 = vsyncadd [#allocation3], 4294966784 }
 0x2ac   :  { %374 = vsyncpa [#allocation3], 1 }

</bundles_post_ra>
